<compile_context>
chip_gen: v6e
topology: v6e:2x2x1
jax: 0.10.0
libtpu: 0.0.40
codegen_flags: <defaults>
</compile_context>

<pallas_src>
import functools

import jax
import jax.numpy as jnp
from jax.experimental import pallas as pl
from jax.experimental.pallas import tpu as pltpu


def _round_up(x, m):
    return ((x + m - 1) // m) * m


def _mlp_kernel(x_ref, w1_ref, b1_ref, w2_ref, b2_ref, o_ref):
    # x_ref : (TB, D_pad) f32    w1_ref: (D_pad, H_pad) bf16   b1_ref: (1, H_pad) f32
    # w2_ref: (H_pad, C_pad) bf16  b2_ref: (1, C_pad) f32      o_ref : (TB, C_pad) f32
    x_bf = x_ref[...].astype(jnp.bfloat16)                 # cast at MXU boundary (hidden under DMA)
    h = jnp.dot(x_bf, w1_ref[...], preferred_element_type=jnp.float32)
    h = jnp.maximum(h + b1_ref[...], 0.0)                  # bias + ReLU in f32 (VPU)
    out = jnp.dot(h.astype(jnp.bfloat16), w2_ref[...],
                  preferred_element_type=jnp.float32)
    o_ref[...] = (out + b2_ref[...]).astype(o_ref.dtype)   # lane-dense unmasked store


def pack_params(w1, b1, w2, b2):
    """Pad/cast parameters once at model-load time (hoisted out of per-call path)."""
    D, H = w1.shape
    C = w2.shape[1]
    D_pad, H_pad, C_pad = _round_up(D, 128), _round_up(H, 128), _round_up(C, 128)
    w1_p = jnp.zeros((D_pad, H_pad), jnp.bfloat16).at[:D, :H].set(w1.astype(jnp.bfloat16))
    w2_p = jnp.zeros((H_pad, C_pad), jnp.bfloat16).at[:H, :C].set(w2.astype(jnp.bfloat16))
    b1_p = jnp.zeros((1, H_pad), jnp.float32).at[0, :H].set(b1.astype(jnp.float32))
    b2_p = jnp.zeros((1, C_pad), jnp.float32).at[0, :C].set(b2.astype(jnp.float32))
    return w1_p, b1_p, w2_p, b2_p


def _choose_tb(B, D_pad, C_pad, resident_bytes):
    """Largest batch tile that fits a v7x-safe ~40 MiB VMEM budget (cap 1024 rows),
    while keeping >= ~4 grid steps when B allows (>= 2 steps per v7x TensorCore)."""
    budget = 40 * 1024 * 1024
    per_row = 2 * D_pad * 4 + 2 * C_pad * 4           # double-buffered f32 x tile + f32 out tile
    tb_fit = max(8, ((budget - resident_bytes) // per_row) // 8 * 8)
    tb_cap = min(1024, tb_fit)
    tb_b = _round_up(max(1, -(-B // 4)), 8)           # ~B/4 rows per grid step, >= 8 sublanes
    return max(8, min(tb_cap, tb_b))


@functools.partial(jax.jit, static_argnames=("num_classes",))
def algorithm_predict(x_nchw, w1_p, b1_p, w2_p, b2_p, *, num_classes):
    """Fused MLP classifier head. x_nchw: (B, C, H, W) float32, params pre-packed."""
    B = x_nchw.shape[0]
    D = 1
    for s in x_nchw.shape[1:]:
        D *= s
    D_pad, H_pad = w1_p.shape
    C_pad = w2_p.shape[1]

    # Resident-weight VMEM: account for Pallas double-buffering even though the
    # index_map is constant (see header comment on pl.Buffered(1)).
    resident_bytes = 2 * (D_pad * H_pad * 2 + H_pad * C_pad * 2 + (H_pad + C_pad) * 4)

    TB = _choose_tb(B, D_pad, C_pad, resident_bytes)
    B_pad = _round_up(B, TB)

    # Glue: flatten NCHW -> (B, D) in f32; pad batch/feature dims only if needed.
    x_flat = x_nchw.reshape(B, D)
    if (B_pad != B) or (D_pad != D):
        x_in = jnp.zeros((B_pad, D_pad), x_flat.dtype).at[:B, :D].set(x_flat)
    else:
        x_in = x_flat

    grid = (B_pad // TB,)

    # VMEM budget: double-buffered x/o tiles + (2x-buffered) resident weights,
    # 2x headroom, capped well under v7x's 64 MiB physical VMEM.
    vmem_bytes = (2 * TB * D_pad * 4          # x tiles (f32, double-buffered)
                  + 2 * TB * C_pad * 4        # out tiles (f32, double-buffered)
                  + resident_bytes)           # weights/biases (x2 buffers)
    vmem_limit = int(min(max(2 * vmem_bytes, 4 * 1024 * 1024), 48 * 1024 * 1024))

    cost = pl.CostEstimate(
        flops=2 * B_pad * D_pad * H_pad + 2 * B_pad * H_pad * C_pad,
        transcendentals=0,
        bytes_accessed=(B_pad * D_pad * 4          # x read in f32 (no wrapper copy)
                        + D_pad * H_pad * 2 + H_pad * C_pad * 2
                        + B_pad * C_pad * 4
                        + (H_pad + C_pad) * 4),
    )

    out_pad = pl.pallas_call(
        _mlp_kernel,
        out_shape=jax.ShapeDtypeStruct((B_pad, C_pad), jnp.float32),
        grid=grid,
        in_specs=[
            pl.BlockSpec((TB, D_pad), lambda i: (i, 0)),      # x: streamed per tile
            pl.BlockSpec((D_pad, H_pad), lambda i: (0, 0)),   # w1: VMEM-resident
            pl.BlockSpec((1, H_pad), lambda i: (0, 0)),       # b1: VMEM-resident
            pl.BlockSpec((H_pad, C_pad), lambda i: (0, 0)),   # w2: VMEM-resident
            pl.BlockSpec((1, C_pad), lambda i: (0, 0)),       # b2: VMEM-resident
        ],
        out_specs=pl.BlockSpec((TB, C_pad), lambda i: (i, 0)),
        compiler_params=pltpu.CompilerParams(
            dimension_semantics=("parallel",),                # v7x: shard batch across TCs
            vmem_limit_bytes=vmem_limit),
        cost_estimate=cost,
    )(x_in, w1_p, b1_p, w2_p, b2_p)

    # Strip batch / class padding before returning to callers.
    return out_pad[:B, :num_classes]


if __name__ == "__main__":
    # Small shapes consistent with the module's constructor args.
    input_shape = (4, 16, 16)          # (C, H, W)
    num_classes = 8
    num_domains = 3                    # unused by the forward pass
    hparams = {"hidden_dim": 32}       # hyperparameter dict

    B = 2
    D = input_shape[0] * input_shape[1] * input_shape[2]   # 1024
    H = hparams["hidden_dim"]

    # Deterministic parameter init (synthetic weights, no checkpoint).
    key = jax.random.PRNGKey(0)
    kx, kw1, kw2 = jax.random.split(key, 3)
    x = jax.random.normal(kx, (B,) + input_shape, dtype=jnp.float32)
    w1 = jax.random.normal(kw1, (D, H), dtype=jnp.float32) * (1.0 / jnp.sqrt(D))
    b1 = jnp.zeros((H,), dtype=jnp.float32)
    w2 = jax.random.normal(kw2, (H, num_classes), dtype=jnp.float32) * (1.0 / jnp.sqrt(H))
    b2 = jnp.zeros((num_classes,), dtype=jnp.float32)

    # Pack / cast parameters once (model-load time), not per forward call.
    w1_p, b1_p, w2_p, b2_p = pack_params(w1, b1, w2, b2)
    w1_p, b1_p, w2_p, b2_p = jax.block_until_ready((w1_p, b1_p, w2_p, b2_p))

    logits = algorithm_predict(x, w1_p, b1_p, w2_p, b2_p, num_classes=num_classes)
    jax.block_until_ready(logits)
    assert logits.shape == (B, num_classes)

    # Reference with identical bf16 matmul inputs / f32 accumulation.
    x_bf = x.reshape(B, D).astype(jnp.bfloat16)
    h_ref = jnp.dot(x_bf, w1.astype(jnp.bfloat16),
                    preferred_element_type=jnp.float32) + b1
    h_ref = jnp.maximum(h_ref, 0.0)
    ref = jnp.dot(h_ref.astype(jnp.bfloat16), w2.astype(jnp.bfloat16),
                  preferred_element_type=jnp.float32) + b2
    assert jnp.allclose(logits, ref, atol=1e-3, rtol=1e-3)

    # Sanity check vs. pure-f32 math (bf16 quantization tolerance).
    # NOTE: logits are bf16-matmul / f32-accumulate, not f32-exact.
    ref_f32 = jnp.maximum(x.reshape(B, D) @ w1 + b1, 0.0) @ w2 + b2
    assert jnp.allclose(logits, ref_f32, atol=5e-2, rtol=5e-2)

    print("KERNEL_OK")
</pallas_src>

<mosaic_0001>
module attributes {stable_mosaic.version = 11 : i64} {
  func.func @_mlp_kernel(%arg0: i32, %arg1: memref<8x1024xf32, #tpu.memory_space<vmem>>, %arg2: memref<1024x128xbf16, #tpu.memory_space<vmem>>, %arg3: memref<1x128xf32, #tpu.memory_space<vmem>>, %arg4: memref<128x128xbf16, #tpu.memory_space<vmem>>, %arg5: memref<1x128xf32, #tpu.memory_space<vmem>>, %arg6: memref<8x128xf32, #tpu.memory_space<vmem>>) attributes {dimension_semantics = [#tpu.dimension_semantics<parallel>], iteration_bounds = array<i64: 1>, scalar_prefetch = 0 : i64, scratch_operands = 0 : i64, tpu.core_type = #tpu.core_type<tc>, window_params = [{transform_indices = @transform_0, window_bounds = array<i64: 8, 1024>}, {pipeline_mode = #tpu.pipeline_mode<synchronous>, transform_indices = @transform_1, window_bounds = array<i64: 1024, 128>}, {pipeline_mode = #tpu.pipeline_mode<synchronous>, transform_indices = @transform_2, window_bounds = array<i64: 1, 128>}, {pipeline_mode = #tpu.pipeline_mode<synchronous>, transform_indices = @transform_3, window_bounds = array<i64: 128, 128>}, {pipeline_mode = #tpu.pipeline_mode<synchronous>, transform_indices = @transform_4, window_bounds = array<i64: 1, 128>}, {transform_indices = @transform_5, window_bounds = array<i64: 8, 128>}]} {
    %c0 = arith.constant 0 : index
    %c0_0 = arith.constant 0 : index
    %0 = vector.load %arg1[%c0, %c0_0] : memref<8x1024xf32, #tpu.memory_space<vmem>>, vector<8x1024xf32>
    %1 = arith.truncf %0 : vector<8x1024xf32> to vector<8x1024xbf16>
    %c0_1 = arith.constant 0 : index
    %c0_2 = arith.constant 0 : index
    %2 = vector.load %arg2[%c0_1, %c0_2] : memref<1024x128xbf16, #tpu.memory_space<vmem>>, vector<1024x128xbf16>
    %cst = arith.constant dense<0.000000e+00> : vector<8x128xf32>
    %3 = tpu.matmul %1, %2, %cst {dimension_numbers = #tpu.dot_dimension_numbers<[1], [0], [0], [1], [0, 0, 1, 1], [], []>} : vector<8x1024xbf16>, vector<1024x128xbf16>, vector<8x128xf32> -> vector<8x128xf32>
    %c0_3 = arith.constant 0 : index
    %c0_4 = arith.constant 0 : index
    %4 = vector.load %arg3[%c0_3, %c0_4] : memref<1x128xf32, #tpu.memory_space<vmem>>, vector<1x128xf32>
    %5 = vector.broadcast %4 : vector<1x128xf32> to vector<8x128xf32>
    %6 = arith.addf %3, %5 : vector<8x128xf32>
    %cst_5 = arith.constant 0.000000e+00 : f32
    %7 = vector.broadcast %cst_5 : f32 to vector<8x128xf32>
    %8 = arith.maximumf %6, %7 : vector<8x128xf32>
    %9 = arith.truncf %8 : vector<8x128xf32> to vector<8x128xbf16>
    %c0_6 = arith.constant 0 : index
    %c0_7 = arith.constant 0 : index
    %10 = vector.load %arg4[%c0_6, %c0_7] : memref<128x128xbf16, #tpu.memory_space<vmem>>, vector<128x128xbf16>
    %cst_8 = arith.constant dense<0.000000e+00> : vector<8x128xf32>
    %11 = tpu.matmul %9, %10, %cst_8 {dimension_numbers = #tpu.dot_dimension_numbers<[1], [0], [0], [1], [0, 0, 1, 1], [], []>} : vector<8x128xbf16>, vector<128x128xbf16>, vector<8x128xf32> -> vector<8x128xf32>
    %c0_9 = arith.constant 0 : index
    %c0_10 = arith.constant 0 : index
    %12 = vector.load %arg5[%c0_9, %c0_10] : memref<1x128xf32, #tpu.memory_space<vmem>>, vector<1x128xf32>
    %13 = vector.broadcast %12 : vector<1x128xf32> to vector<8x128xf32>
    %14 = arith.addf %11, %13 : vector<8x128xf32>
    %c0_11 = arith.constant 0 : index
    %c0_12 = arith.constant 0 : index
    %15 = vector.load %arg6[%c0_11, %c0_12] : memref<8x128xf32, #tpu.memory_space<vmem>>, vector<8x128xf32>
    tpu.vector_store %arg6[%c0_11, %c0_12], %14 {strides = array<i32>} : memref<8x128xf32, #tpu.memory_space<vmem>>, vector<8x128xf32>,
    return
  }
  func.func @transform_0(%arg0: i32) -> (i32, i32) {
    %c0_i32 = arith.constant 0 : i32
    %c0_i32_0 = arith.constant 0 : i32
    return %arg0, %c0_i32 : i32, i32
  }
  func.func @transform_1(%arg0: i32) -> (i32, i32) {
    %c0_i32 = arith.constant 0 : i32
    %c0_i32_0 = arith.constant 0 : i32
    %c0_i32_1 = arith.constant 0 : i32
    return %c0_i32, %c0_i32_0 : i32, i32
  }
  func.func @transform_2(%arg0: i32) -> (i32, i32) {
    %c0_i32 = arith.constant 0 : i32
    %c0_i32_0 = arith.constant 0 : i32
    %c0_i32_1 = arith.constant 0 : i32
    return %c0_i32, %c0_i32_0 : i32, i32
  }
  func.func @transform_3(%arg0: i32) -> (i32, i32) {
    %c0_i32 = arith.constant 0 : i32
    %c0_i32_0 = arith.constant 0 : i32
    %c0_i32_1 = arith.constant 0 : i32
    return %c0_i32, %c0_i32_0 : i32, i32
  }
  func.func @transform_4(%arg0: i32) -> (i32, i32) {
    %c0_i32 = arith.constant 0 : i32
    %c0_i32_0 = arith.constant 0 : i32
    %c0_i32_1 = arith.constant 0 : i32
    return %c0_i32, %c0_i32_0 : i32, i32
  }
  func.func @transform_5(%arg0: i32) -> (i32, i32) {
    %c0_i32 = arith.constant 0 : i32
    %c0_i32_0 = arith.constant 0 : i32
    return %arg0, %c0_i32 : i32, i32
  }
}

</mosaic_0001>

<bundles_post_ra>
// kernel: algorithm_predict.1
= control target key start
LH: loop header
LB: loop body
LE: loop exit
PB: predicated region body
PF: predicated region fallthrough
CT: control target
= control target key end

     0   :  { %10 = vsyncpa [#allocation3], 0  ;;  %s1139_s18 = smov [#allocation2]   ;;  %s1234_s0 = inlined_call_operand.vmem [shape: f32[8,1024], index: 0, kind: input, shape index: {}]   ;;  %s1235_s1 = inlined_call_operand.hbm [shape: bf16[1024,128], index: 1, kind: input, shape index: {}]   ;;  %s1236_s2 = inlined_call_operand.vmem [shape: f32[1,128], index: 2, kind: input, shape index: {}]   ;;  %s1237_s3 = inlined_call_operand.vmem [shape: bf16[128,128], index: 3, kind: input, shape index: {}]   ;;  %s1238_s4 = inlined_call_operand.vmem [shape: f32[1,128], index: 4, kind: input, shape index: {}]   ;;  %s1239_s5 = inlined_call_operand.vmem [shape: f32[8,128], index: 5, kind: output, shape index: {}]  }
   0x1   :  { %s18_s19 = sshll.u32 %s1139_s18, 4  ;;  %s19_s19 = int_to_ptr.vmem [resolvable:$true] %s18_s19 }
   0x2   :  { %s1125_s20 = scalar_lea.vmem %s19_s19, 8192  ;;  %p1130_p1 = scmp.lt.s32.totalorder %s19_s19, %s19_s19 }
   0x3   :  { %p1126_p0 = scmp.ne.s32.totalorder %s19_s19, %s1125_s20  ;;  %p1131_p2 = scmp.lt.s32.totalorder %s1125_s20, %s1125_s20 }
   0x5   :  { %p1132_p3 = por %p1131_p2, %p1130_p1 }
   0x7   :  { %p1133_p4 = pnand %p1132_p3, %p1126_p0 }
   0x9   :  { %1136 = shalt.err (!%p1133_p4)
}
   0xa   :  { %s1140_s21 = smov 64   ;;  %s1141_s22 = smov 4  }
   0xb   :  { %24 = dma.hbm_to_vmem [thread:$0]  %s1235_s1, 8192, %s19_s19, [#allocation3], %s1140_s21, %s1140_s21, %s1141_s22  }
   0xc   :  { %1137 = dma.done.wait [#allocation3], 8192  }
   0xd   :  { %1138 = vsyncadd [#allocation3], 4294959104  ;;  %v1045_v0 = vld [vmem:[#allocation2 + $0x78] sm:$0xff]   ;;  %v1049_v4 = vld [vmem:[#allocation2 + $0x70] sm:$0xff]   ;;  %vm1143_vm0 = vmmov 0  }
   0xe   :  { %v1046_v1 = vld [vmem:[#allocation2 + $0xf8] sm:$0xff]   ;;  %923 = vmatprep.subr.bf16.mxu0 %v1045_v0  ;;  %v1050_v5 = vld [vmem:[#allocation2 + $0xf0] sm:$0xff]   ;;  %v1053_v8 = vld [vmem:[#allocation2 + $0x68] sm:$0xff]  }
   0xf   :  { %v1047_v2 = vld [vmem:[#allocation2 + $0x38] sm:$0xff]   ;;  %945 = vmatprep.subr.bf16.mxu1 %v1046_v1  ;;  %v1051_v6 = vld [vmem:[#allocation2 + $0x30] sm:$0xff]   ;;  %v1054_v9 = vld [vmem:[#allocation2 + $0xe8] sm:$0xff]  }
  0x10   :  { %v1048_v3 = vld [vmem:[#allocation2 + $0xb8] sm:$0xff]   ;;  %924 = vmatpush3.bf16.msra.mxu0 %v1047_v2  ;;  %v1052_v7 = vld [vmem:[#allocation2 + $0xb0] sm:$0xff]   ;;  %v1055_v10 = vld [vmem:[#allocation2 + $0x28] sm:$0xff]  }
  0x11   :  { %946 = vmatpush3.bf16.msra.mxu1 %v1048_v3  ;;  %925 = vmatprep.subr.bf16.mxu0 %v1049_v4  ;;  %v1056_v11 = vld [vmem:[#allocation2 + $0xa8] sm:$0xff]   ;;  %v1057_v12 = vld [vmem:[#allocation2 + $0x60] sm:$0xff]   ;;  %v1061_v16 = vld [vmem:[#allocation2 + $0x58] sm:$0xff]  }
  0x12   :  { %947 = vmatprep.subr.bf16.mxu1 %v1050_v5  ;;  %v1058_v13 = vld [vmem:[#allocation2 + $0xe0] sm:$0xff]   ;;  %v1062_v17 = vld [vmem:[#allocation2 + $0xd8] sm:$0xff]   ;;  %v1065_v20 = vld [vmem:[#allocation2 + $0x50] sm:$0xff]  }
  0x13   :  { %v1059_v14 = vld [vmem:[#allocation2 + $0x20] sm:$0xff]   ;;  %v1063_v18 = vld [vmem:[#allocation2 + $0x18] sm:$0xff]   ;;  %v1066_v21 = vld [vmem:[#allocation2 + $0xd0] sm:$0xff]  }
  0x14   :  { %926 = vmatpush3.bf16.msra.mxu0 %v1051_v6  ;;  %v1060_v15 = vld [vmem:[#allocation2 + $0xa0] sm:$0xff]   ;;  %v1064_v19 = vld [vmem:[#allocation2 + $0x98] sm:$0xff]   ;;  %v1067_v22 = vld [vmem:[#allocation2 + $0x10] sm:$0xff]  }
  0x15   :  { %948 = vmatpush3.bf16.msra.mxu1 %v1052_v7  ;;  %927 = vmatprep.subr.bf16.mxu0 %v1053_v8  ;;  %v1068_v23 = vld [vmem:[#allocation2 + $0x90] sm:$0xff]   ;;  %v1069_v24 = vld [vmem:[#allocation2 + $0x48] sm:$0xff]   ;;  %v1073_v28 = vld [vmem:[#allocation2 + $0x40] sm:$0xff]  }
  0x16   :  { %949 = vmatprep.subr.bf16.mxu1 %v1054_v9  ;;  %v1070_v25 = vld [vmem:[#allocation2 + $0xc8] sm:$0xff]   ;;  %v1074_v29 = vld [vmem:[#allocation2 + $0xc0] sm:$0xff]   ;;  %v38_v33 = vld [vmem:[%s1234_s0 + $0x18] sm:$0xff] }
  0x17   :  { %v1071_v26 = vld [vmem:[#allocation2 + $0x8] sm:$0xff]   ;;  %v1075_v30 = vld [vmem:[#allocation2] sm:$0xff]   ;;  %v46_v36 = vpack.c.bf16 %v38_v33, %v38_v33  ;;  %v37_v38 = vld [vmem:[%s1234_s0 + $0x10] sm:$0xff] }
  0x18   :  { %928 = vmatpush3.bf16.msra.mxu0 %v1055_v10  ;;  %v1072_v27 = vld [vmem:[#allocation2 + $0x88] sm:$0xff]   ;;  %v1076_v31 = vld [vmem:[#allocation2 + $0x80] sm:$0xff]   ;;  %v45_v39 = vpack.c.bf16 %v37_v38, %v37_v38  ;;  %v1077_v40 = vld [vmem:[#allocation2 + $0x178] sm:$0xff]  }
  0x19   :  { %950 = vmatpush3.bf16.msra.mxu1 %v1056_v11  ;;  %929 = vmatprep.subr.bf16.mxu0 %v1057_v12  ;;  %v36_v32 = vld [vmem:[%s1234_s0 + $0x8] sm:$0xff]  ;;  %v35_v34 = vld [vmem:[%s1234_s0] sm:$0xff]  ;;  %v1078_v41 = vld [vmem:[#allocation2 + $0x1f8] sm:$0xff]  }
  0x1a   :  { %951 = vmatprep.subr.bf16.mxu1 %v1058_v13  ;;  %v44_v35 = vpack.c.bf16 %v36_v32, %v36_v32  ;;  %v43_v37 = vpack.c.bf16 %v35_v34, %v35_v34  ;;  %642 = vmatprep.mubr.bf16.mxu1 %v46_v36  ;;  %v1079_v42 = vld [vmem:[#allocation2 + $0x138] sm:$0xff]   ;;  %v1081_v44 = vld [vmem:[#allocation2 + $0x170] sm:$0xff]   ;;  %v1085_v48 = vld [vmem:[#allocation2 + $0x168] sm:$0xff]  }
  0x1b   :  { %v1080_v43 = vld [vmem:[#allocation2 + $0x1b8] sm:$0xff]   ;;  %v1082_v45 = vld [vmem:[#allocation2 + $0x1f0] sm:$0xff]   ;;  %v1086_v49 = vld [vmem:[#allocation2 + $0x1e8] sm:$0xff]  }
  0x1c   :  { %930 = vmatpush3.bf16.msra.mxu0 %v1059_v14  ;;  %602 = vmatprep.mubr.bf16.mxu0 %v44_v35  ;;  %v1083_v46 = vld [vmem:[#allocation2 + $0x130] sm:$0xff]   ;;  %v1087_v50 = vld [vmem:[#allocation2 + $0x128] sm:$0xff]   ;;  %v1089_v52 = vld [vmem:[#allocation2 + $0x160] sm:$0xff]  }
  0x1d   :  { %952 = vmatpush3.bf16.msra.mxu1 %v1060_v15  ;;  %931 = vmatprep.subr.bf16.mxu0 %v1061_v16  ;;  %v1084_v47 = vld [vmem:[#allocation2 + $0x1b0] sm:$0xff]   ;;  %v1088_v51 = vld [vmem:[#allocation2 + $0x1a8] sm:$0xff]   ;;  %v1090_v53 = vld [vmem:[#allocation2 + $0x1e0] sm:$0xff]  }
  0x1e   :  { %953 = vmatprep.subr.bf16.mxu1 %v1062_v17  ;;  %v1091_v54 = vld [vmem:[#allocation2 + $0x120] sm:$0xff]   ;;  %v1093_v56 = vld [vmem:[#allocation2 + $0x158] sm:$0xff]   ;;  %v1097_v60 = vld [vmem:[#allocation2 + $0x150] sm:$0xff]   ;;  %v1142_v17 = vmov 0.0  }
  0x1f   :  { %v1092_v55 = vld [vmem:[#allocation2 + $0x1a0] sm:$0xff]   ;;  %v1094_v57 = vld [vmem:[#allocation2 + $0x1d8] sm:$0xff]   ;;  %v1098_v61 = vld [vmem:[#allocation2 + $0x1d0] sm:$0xff]  }
  0x20   :  { %932 = vmatpush3.bf16.msra.mxu0 %v1063_v18  ;;  %v1095_v58 = vld [vmem:[#allocation2 + $0x118] sm:$0xff]   ;;  %v1099_v62 = vld [vmem:[#allocation2 + $0x110] sm:$0xff]   ;;  %v1101_v0 = vld [vmem:[#allocation2 + $0x148] sm:$0xff]  }
  0x21   :  { %954 = vmatpush3.bf16.msra.mxu1 %v1064_v19  ;;  %933 = vmatprep.subr.bf16.mxu0 %v1065_v20  ;;  %v1096_v59 = vld [vmem:[#allocation2 + $0x198] sm:$0xff]   ;;  %v1100_v63 = vld [vmem:[#allocation2 + $0x190] sm:$0xff]   ;;  %v1102_v1 = vld [vmem:[#allocation2 + $0x1c8] sm:$0xff]  }
  0x22   :  { %955 = vmatprep.subr.bf16.mxu1 %v1066_v21  ;;  %v1103_v2 = vld [vmem:[#allocation2 + $0x108] sm:$0xff]   ;;  %v1105_v4 = vld [vmem:[#allocation2 + $0x140] sm:$0xff]   ;;  %v42_v9 = vld [vmem:[%s1234_s0 + $0x38] sm:$0xff] }
  0x23   :  { %v1104_v3 = vld [vmem:[#allocation2 + $0x188] sm:$0xff]   ;;  %v1106_v5 = vld [vmem:[#allocation2 + $0x1c0] sm:$0xff]   ;;  %v50_v11 = vpack.c.bf16 %v42_v9, %v42_v9  ;;  %v41_v13 = vld [vmem:[%s1234_s0 + $0x30] sm:$0xff] }
  0x24   :  { %934 = vmatpush3.bf16.msra.mxu0 %v1067_v22  ;;  %v1107_v6 = vld [vmem:[#allocation2 + $0x100] sm:$0xff]   ;;  %v40_v8 = vld [vmem:[%s1234_s0 + $0x28] sm:$0xff]  ;;  %v49_v15 = vpack.c.bf16 %v41_v13, %v41_v13  ;;  %v1109_v16 = vld [vmem:[%s1237_s3 + $0x38] sm:$0xff]  }
  0x25   :  { %956 = vmatpush3.bf16.msra.mxu1 %v1068_v23  ;;  %935 = vmatprep.subr.bf16.mxu0 %v1069_v24  ;;  %v1108_v7 = vld [vmem:[#allocation2 + $0x180] sm:$0xff]   ;;  %v48_v10 = vpack.c.bf16 %v40_v8, %v40_v8  ;;  %v1110_v18 = vld [vmem:[%s1237_s3 + $0x30] sm:$0xff]   ;;  %v1111_v19 = vld [vmem:[%s1237_s3 + $0x28] sm:$0xff]  }
  0x26   :  { %957 = vmatprep.subr.bf16.mxu1 %v1070_v25  ;;  %v39_v12 = vld [vmem:[%s1234_s0 + $0x20] sm:$0xff]  ;;  %v1113_v21 = vld [vmem:[%s1237_s3 + $0x18] sm:$0xff]   ;;  %v1114_v22 = vld [vmem:[%s1237_s3 + $0x10] sm:$0xff]  }
  0x27   :  { %v47_v14 = vpack.c.bf16 %v39_v12, %v39_v12  ;;  %v1112_v20 = vld [vmem:[%s1237_s3 + $0x20] sm:$0xff]   ;;  %v1115_v23 = vld [vmem:[%s1237_s3 + $0x8] sm:$0xff]  }
  0x28   :  { %936 = vmatpush3.bf16.msra.mxu0 %v1071_v26  ;;  %v1116_v24 = vld [vmem:[%s1237_s3] sm:$0xff]  }
  0x29   :  { %958 = vmatpush3.bf16.msra.mxu1 %v1072_v27  ;;  %937 = vmatprep.subr.bf16.mxu0 %v1073_v28  ;;  %v849_v34 = vld [vmem:[%s1236_s2] ss:$0 sm:$0xff] }
  0x2a   :  { %959 = vmatprep.subr.bf16.mxu1 %v1074_v29 }
  0x2c   :  { %938 = vmatpush3.bf16.msra.mxu0 %v1075_v30 }
  0x2d   :  { %960 = vmatpush3.bf16.msra.mxu1 %v1076_v31  ;;  %967 = vmatprep.subr.bf16.mxu0 %v1077_v40 }
  0x2e   :  { %989 = vmatprep.subr.bf16.mxu1 %v1078_v41 }
  0x2f   :  { %603 = vmatmul.mubr.bf16.vlgmr.msra.gmra.mxu0 %v43_v37 }
  0x30   :  { %643 = vmatmul.mubr.bf16.vlgmr.msra.gmra.mxu1 %v45_v39  ;;  %968 = vmatpush3.bf16.msra.mxu0 %v1079_v42 }
  0x31   :  { %990 = vmatpush3.bf16.msra.mxu1 %v1080_v43  ;;  %969 = vmatprep.subr.bf16.mxu0 %v1081_v44 }
  0x32   :  { %991 = vmatprep.subr.bf16.mxu1 %v1082_v45  ;;  %682 = vmatprep.mubr.bf16.mxu0 %v48_v10 }
  0x33   :  { %722 = vmatprep.mubr.bf16.mxu1 %v50_v11 }
  0x34   :  { %970 = vmatpush3.bf16.msra.mxu0 %v1083_v46 }
  0x35   :  { %992 = vmatpush3.bf16.msra.mxu1 %v1084_v47  ;;  %971 = vmatprep.subr.bf16.mxu0 %v1085_v48 }
  0x36   :  { %993 = vmatprep.subr.bf16.mxu1 %v1086_v49 }
  0x38   :  { %972 = vmatpush3.bf16.msra.mxu0 %v1087_v50 }
  0x39   :  { %994 = vmatpush3.bf16.msra.mxu1 %v1088_v51  ;;  %973 = vmatprep.subr.bf16.mxu0 %v1089_v52  ;;  %v914_v52 = vld [vmem:[%s1238_s4] ss:$0 sm:$0xff] }
  0x3a   :  { %995 = vmatprep.subr.bf16.mxu1 %v1090_v53 }
  0x3c   :  { %974 = vmatpush3.bf16.msra.mxu0 %v1091_v54 }
  0x3d   :  { %996 = vmatpush3.bf16.msra.mxu1 %v1092_v55  ;;  %975 = vmatprep.subr.bf16.mxu0 %v1093_v56 }
  0x3e   :  { %997 = vmatprep.subr.bf16.mxu1 %v1094_v57 }
  0x40   :  { %976 = vmatpush3.bf16.msra.mxu0 %v1095_v58 }
  0x41   :  { %998 = vmatpush3.bf16.msra.mxu1 %v1096_v59  ;;  %977 = vmatprep.subr.bf16.mxu0 %v1097_v60 }
  0x42   :  { %999 = vmatprep.subr.bf16.mxu1 %v1098_v61 }
  0x44   :  { %978 = vmatpush3.bf16.msra.mxu0 %v1099_v62 }
  0x45   :  { %1000 = vmatpush3.bf16.msra.mxu1 %v1100_v63  ;;  %979 = vmatprep.subr.bf16.mxu0 %v1101_v0 }
  0x46   :  { %1001 = vmatprep.subr.bf16.mxu1 %v1102_v1 }
  0x48   :  { %980 = vmatpush3.bf16.msra.mxu0 %v1103_v2 }
  0x49   :  { %1002 = vmatpush3.bf16.msra.mxu1 %v1104_v3  ;;  %981 = vmatprep.subr.bf16.mxu0 %v1105_v4 }
  0x4a   :  { %1003 = vmatprep.subr.bf16.mxu1 %v1106_v5 }
  0x4c   :  { %982 = vmatpush3.bf16.msra.mxu0 %v1107_v6 }
  0x4d   :  { %1004 = vmatpush3.bf16.msra.mxu1 %v1108_v7  ;;  %1020 = vmatprep.subr.bf16.mxu0 %v1142_v17 }
  0x4f   :  { %683 = vmatmul.mubr.bf16.vlgmr.msra.gmra.mxu0 %v47_v14 }
  0x50   :  { %723 = vmatmul.mubr.bf16.vlgmr.msra.gmra.mxu1 %v49_v15  ;;  %1021 = vmatpush3.bf16.msra.mxu0 %v1109_v16 }
  0x51   :  { %1022 = vmatprep.subr.bf16.mxu0 %v1142_v17  ;;  %1036 = vmatprep.mubr.msk.bf16.mxu0 %vm1143_vm0, %v1142_v17 }
  0x54   :  { %1023 = vmatpush3.bf16.msra.mxu0 %v1110_v18 }
  0x55   :  { %1024 = vmatprep.subr.bf16.mxu0 %v1142_v17 }
  0x58   :  { %1025 = vmatpush3.bf16.msra.mxu0 %v1111_v19 }
  0x59   :  { %1026 = vmatprep.subr.bf16.mxu0 %v1142_v17 }
  0x5c   :  { %1027 = vmatpush3.bf16.msra.mxu0 %v1112_v20 }
  0x5d   :  { %1028 = vmatprep.subr.bf16.mxu0 %v1142_v17 }
  0x60   :  { %1029 = vmatpush3.bf16.msra.mxu0 %v1113_v21 }
  0x61   :  { %1030 = vmatprep.subr.bf16.mxu0 %v1142_v17 }
  0x64   :  { %1031 = vmatpush3.bf16.msra.mxu0 %v1114_v22 }
  0x65   :  { %1032 = vmatprep.subr.bf16.mxu0 %v1142_v17 }
  0x68   :  { %1033 = vmatpush3.bf16.msra.mxu0 %v1115_v23 }
  0x69   :  { %1034 = vmatprep.subr.bf16.mxu0 %v1142_v17 }
  0x6c   :  { %1035 = vmatpush3.bf16.msra.mxu0 %v1116_v24 }
  0xef   :  { %v939_v25 = vpop.f32.mrf.mxu0 }
  0xf0   :  { %v961_v26 = vpop.f32.mrf.mxu1 }
  0xf1   :  { %v940_v27 = vpop.f32.mrf.mxu0 }
  0xf2   :  { %v962_v28 = vpop.f32.mrf.mxu1  ;;  %v941_v33 = vadd.f32 %v940_v27, %v939_v25 }
  0xf3   :  { %v942_v29 = vpop.f32.mrf.mxu0  ;;  %v963_v36 = vadd.f32 %v962_v28, %v961_v26 }
  0xf4   :  { %v964_v30 = vpop.f32.mrf.mxu1  ;;  %v605_v35 = vadd.f32 %v941_v33, %v849_v34 }
  0xf5   :  { %v943_v31 = vpop.f32.mrf.mxu0 }
  0xf6   :  { %v965_v32 = vpop.f32.mrf.mxu1  ;;  %v645_v40 = vadd.f32 %v963_v36, %v605_v35 }
 0x10f   :  { %v983_v37 = vpop.f32.mrf.mxu0 }
 0x110   :  { %v1005_v38 = vpop.f32.mrf.mxu1 }
 0x111   :  { %v984_v39 = vpop.f32.mrf.mxu0 }
 0x112   :  { %v985_v41 = vadd.f32 %v984_v39, %v983_v37  ;;  %v1006_v42 = vpop.f32.mrf.mxu1 }
 0x113   :  { %v986_v43 = vpop.f32.mrf.mxu0  ;;  %v1007_v45 = vadd.f32 %v1006_v42, %v1005_v38 }
 0x114   :  { %v685_v44 = vadd.f32 %v985_v41, %v645_v40  ;;  %v1008_v46 = vpop.f32.mrf.mxu1 }
 0x115   :  { %v987_v47 = vpop.f32.mrf.mxu0 }
 0x116   :  { %v725_v48 = vadd.f32 %v1007_v45, %v685_v44  ;;  %v1009_v49 = vpop.f32.mrf.mxu1 }
 0x118   :  { %v730_v50 = vmax.f32 %v725_v48, 0.0 }
 0x11a   :  { %v731_v51 = vpack.c.bf16 %v730_v50, %v730_v50 }
 0x11c   :  { %1037 = vmatmul.mubr.bf16.vlgmr.msra.gmra.mxu0 %v731_v51 }
 0x1dc   :  { %v837_v53 = vpop.f32.mrf.mxu0 }
 0x1dd   :  { %v838_v54 = vadd.f32 %v914_v52, %v837_v53 }
 0x1de   :  { %v1038_v55 = vpop.f32.mrf.mxu0 }
 0x1df   :  { %843 = vst [vmem:[%s1239_s5] sm:$0xff] %v838_v54 }
 0x1e0   :  { %v840_v56 = vpop.f32.mrf.mxu0 }
 0x1e2   :  { %v1039_v57 = vpop.f32.mrf.mxu0 }
 0x1e3   :  { %848 = vsyncpa [#allocation3], 1 }

</bundles_post_ra>
